<compile_context>
chip_gen: v6e
topology: v6e:2x2x1
jax: 0.10.0
libtpu: 0.0.40
codegen_flags: <defaults>
</compile_context>

<pallas_src>
import functools

import jax
import jax.numpy as jnp
from jax.experimental import pallas as pl
from jax.experimental.pallas import tpu as pltpu


def _conv_bn_relu_kernel(x_ref, w_ref, b_ref, o_ref, *, tap_offsets, tm):
    # x_ref: (C_in_p, TM + E)        bf16  halo'd, flattened-spatial input tile
    # w_ref: (kh*kw, C_out, C_in_p)  bf16  BN-folded weight, one tap per row
    # b_ref: (C_out, 1)              f32   BN-folded bias
    # o_ref: (C_out, TM)             TM on lanes -> dense (unmasked) stores
    off0 = tap_offsets[0]
    acc = jnp.dot(w_ref[0], x_ref[:, off0:off0 + tm],
                  preferred_element_type=jnp.float32)
    for t in range(1, len(tap_offsets)):
        off = tap_offsets[t]
        acc = acc + jnp.dot(w_ref[t], x_ref[:, off:off + tm],
                            preferred_element_type=jnp.float32)
    acc = acc + b_ref[...]
    o_ref[...] = jnp.maximum(acc, 0.0).astype(o_ref.dtype)


def basic_conv2d_forward(x, conv_weight, bn_gamma, bn_beta, bn_mean, bn_var,
                         *, stride=(1, 1), padding=(1, 1), eps=1e-5,
                         max_tile=2048, min_grid_steps=8):
    """BasicConv2d forward: Conv2d(bias=False) -> BatchNorm2d (eval) -> ReLU.

    x:           (N, C_in, H, W)        NCHW, like PyTorch
    conv_weight: (C_out, C_in, kh, kw)  OIHW, like PyTorch
    bn_*:        (C_out,)
    Returns (N, C_out, H_out, W_out) in NCHW.
    """
    N, C_in, H, W = x.shape
    C_out, C_in2, kh, kw = conv_weight.shape
    assert C_in2 == C_in
    sh, sw = stride
    ph, pw = padding

    Hp, Wp = H + 2 * ph, W + 2 * pw
    H1, W1 = Hp - kh + 1, Wp - kw + 1               # stride-1 output extent
    assert H1 > 0 and W1 > 0

    # ---- grid-invariant precompute (wrapper, not per-grid-step) -------------
    # Fold eval-mode BN into a per-output-channel scale & bias.
    scale = bn_gamma * jax.lax.rsqrt(bn_var + eps)                  # (C_out,)
    bias = bn_beta - bn_mean * scale                                # (C_out,)
    cin_p = ((C_in + 7) // 8) * 8        # pad C_in to a sublane multiple (no-op if aligned)
    w_f = (conv_weight * scale[:, None, None, None]).astype(jnp.float32)
    # (kh, kw, C_out, C_in) -> (kh*kw, C_out, C_in), taps ordered t = i*kw + j
    w_taps = jnp.transpose(w_f, (2, 3, 0, 1)).reshape(kh * kw, C_out, C_in)
    w_taps = jnp.pad(w_taps, ((0, 0), (0, 0), (0, cin_p - C_in))).astype(jnp.bfloat16)
    b_col = bias.reshape(C_out, 1).astype(jnp.float32)

    # ---- flattened, padded activations (bf16; channels stay leading) --------
    x_pad = jnp.pad(x, ((0, 0), (0, cin_p - C_in), (ph, ph), (pw, pw)))
    x_flat = x_pad.reshape(N, cin_p, Hp * Wp).astype(jnp.bfloat16)

    P_raw = Hp * Wp                        # stride-1 positions per image (full width)
    E = (kh - 1) * Wp + (kw - 1)           # max tap offset (halo extent, flattened)

    # ---- tile size: big lane-dense tiles, but keep >= ~min_grid_steps steps -
    LANE = 128
    tiles_per_image = max(1, -(-min_grid_steps // N))
    tm = -(-P_raw // tiles_per_image)
    tm = min(max_tile, max(LANE, -(-tm // LANE) * LANE))   # multiple of 128
    ntiles = -(-P_raw // tm)
    P_pad = ntiles * tm

    # Halo'd, overlapping input tiles: (N, ntiles, C_in_p, tm + E).
    # Duplication is only ~E/tm of the input (vs. 9x for HBM im2col).
    x_flat = jnp.pad(x_flat, ((0, 0), (0, 0), (0, P_pad + E - P_raw)))
    x_tiles = jnp.stack([x_flat[:, :, k * tm:k * tm + tm + E]
                         for k in range(ntiles)], axis=1)

    # Tap (i, j) reads input position p + i*Wp + j for output position p.
    tap_offsets = tuple(i * Wp + j for i in range(kh) for j in range(kw))

    kernel = functools.partial(_conv_bn_relu_kernel,
                               tap_offsets=tap_offsets, tm=tm)

    out_itemsize = jnp.dtype(x.dtype).itemsize
    flops = 2 * N * P_pad * C_out * cin_p * kh * kw
    bytes_accessed = (N * ntiles * cin_p * (tm + E) * 2          # bf16 tiles
                      + kh * kw * C_out * cin_p * 2              # bf16 weights
                      + C_out * 4                                # f32 bias
                      + N * C_out * P_pad * out_itemsize)        # output

    out = pl.pallas_call(
        kernel,
        out_shape=jax.ShapeDtypeStruct((N, C_out, P_pad), x.dtype),
        grid_spec=pltpu.PrefetchScalarGridSpec(
            num_scalar_prefetch=0,
            grid=(N, ntiles),
            in_specs=[
                # halo'd activation tile for (image n, tile k)
                pl.BlockSpec((None, None, cin_p, tm + E),
                             lambda n, k: (n, k, 0, 0)),
                # folded weights / bias: tiny replicated operands
                pl.BlockSpec((kh * kw, C_out, cin_p), lambda n, k: (0, 0, 0)),
                pl.BlockSpec((C_out, 1), lambda n, k: (0, 0)),
            ],
            out_specs=pl.BlockSpec((None, C_out, tm), lambda n, k: (n, 0, k)),
        ),
        compiler_params=pltpu.CompilerParams(
            dimension_semantics=("parallel", "parallel"),
            vmem_limit_bytes=32 * 1024 * 1024),   # explicit: safe on v7x (64 MiB phys)
        cost_estimate=pl.CostEstimate(flops=flops, transcendentals=0,
                                      bytes_accessed=bytes_accessed),
    )(x_tiles, w_taps, b_col)

    # positions -> NCHW needs only slicing (no transpose); stride via subsample.
    out = out[:, :, :P_raw].reshape(N, C_out, Hp, Wp)[:, :, :H1, :W1]
    out = out[:, :, ::sh, ::sw]
    return out


if __name__ == "__main__":
    # Small shapes consistent with BasicConv2d(in_channels=4, out_channels=32,
    # kernel_size=3, padding=1) applied to an NCHW input.
    N, C_in, H, W = 2, 4, 16, 16
    C_out, kh, kw = 32, 3, 3
    eps = 1e-5

    key = jax.random.PRNGKey(0)
    kx, kw_, km, kv, kg, kb = jax.random.split(key, 6)

    x = jax.random.normal(kx, (N, C_in, H, W), dtype=jnp.float32)
    fan_out = C_out * kh * kw
    conv_weight = jax.random.normal(kw_, (C_out, C_in, kh, kw),
                                    dtype=jnp.float32) * jnp.sqrt(2.0 / fan_out)
    # BN params / running stats (non-trivial to exercise the folding).
    bn_gamma = 1.0 + 0.1 * jax.random.normal(kg, (C_out,), dtype=jnp.float32)
    bn_beta = 0.1 * jax.random.normal(kb, (C_out,), dtype=jnp.float32)
    bn_mean = 0.1 * jax.random.normal(km, (C_out,), dtype=jnp.float32)
    bn_var = jax.random.uniform(kv, (C_out,), minval=0.5, maxval=1.5,
                                dtype=jnp.float32)

    out = basic_conv2d_forward(x, conv_weight, bn_gamma, bn_beta,
                               bn_mean, bn_var,
                               stride=(1, 1), padding=(1, 1), eps=eps)
    out = jax.block_until_ready(out)

    # Pure-JAX reference: conv -> eval-mode BN -> ReLU (f32).
    ref_conv = jax.lax.conv_general_dilated(
        x, conv_weight, window_strides=(1, 1), padding=[(1, 1), (1, 1)],
        dimension_numbers=("NCHW", "OIHW", "NCHW"))
    scale = bn_gamma / jnp.sqrt(bn_var + eps)
    shift = bn_beta - bn_mean * scale
    ref = jnp.maximum(
        ref_conv * scale[None, :, None, None] + shift[None, :, None, None], 0.0)

    assert out.shape == (N, C_out, H, W), out.shape
    # bf16 activations/weights (f32 accumulation) -> loosened tolerance vs f32 ref.
    assert jnp.allclose(out, ref, atol=3e-2, rtol=3e-2), \
        float(jnp.max(jnp.abs(out - ref)))

    print("KERNEL_OK")
</pallas_src>

<mosaic_0001>
module attributes {stable_mosaic.version = 11 : i64} {
  func.func @_conv_bn_relu_kernel(%arg0: i32, %arg1: i32, %arg2: memref<1x1x8x166xbf16, #tpu.memory_space<vmem>>, %arg3: memref<9x32x8xbf16, #tpu.memory_space<vmem>>, %arg4: memref<32x1xf32, #tpu.memory_space<vmem>>, %arg5: memref<1x32x128xf32, #tpu.memory_space<vmem>>) attributes {dimension_semantics = [#tpu.dimension_semantics<parallel>, #tpu.dimension_semantics<parallel>], iteration_bounds = array<i64: 2, 3>, scalar_prefetch = 0 : i64, scratch_operands = 0 : i64, tpu.core_type = #tpu.core_type<tc>, window_params = [{transform_indices = @transform_0, window_bounds = array<i64: 1, 1, 8, 166>}, {pipeline_mode = #tpu.pipeline_mode<synchronous>, transform_indices = @transform_1, window_bounds = array<i64: 9, 32, 8>}, {pipeline_mode = #tpu.pipeline_mode<synchronous>, transform_indices = @transform_2, window_bounds = array<i64: 32, 1>}, {transform_indices = @transform_3, window_bounds = array<i64: 1, 32, 128>}]} {
    %c0 = arith.constant 0 : index
    %c0_0 = arith.constant 0 : index
    %c0_1 = arith.constant 0 : index
    %0 = vector.load %arg3[%c0, %c0_0, %c0_1] : memref<9x32x8xbf16, #tpu.memory_space<vmem>>, vector<1x32x8xbf16>
    %1 = vector.shape_cast %0 : vector<1x32x8xbf16> to vector<32x8xbf16>
    %c0_2 = arith.constant 0 : index
    %c0_3 = arith.constant 0 : index
    %c0_4 = arith.constant 0 : index
    %c0_5 = arith.constant 0 : index
    %2 = vector.load %arg2[%c0_2, %c0_3, %c0_4, %c0_5] : memref<1x1x8x166xbf16, #tpu.memory_space<vmem>>, vector<1x1x8x128xbf16>
    %3 = vector.shape_cast %2 : vector<1x1x8x128xbf16> to vector<8x128xbf16>
    %cst = arith.constant dense<0.000000e+00> : vector<32x128xf32>
    %4 = tpu.matmul %1, %3, %cst {dimension_numbers = #tpu.dot_dimension_numbers<[1], [0], [0], [1], [0, 0, 1, 1], [], []>} : vector<32x8xbf16>, vector<8x128xbf16>, vector<32x128xf32> -> vector<32x128xf32>
    %c1 = arith.constant 1 : index
    %c0_6 = arith.constant 0 : index
    %c0_7 = arith.constant 0 : index
    %5 = vector.load %arg3[%c1, %c0_6, %c0_7] : memref<9x32x8xbf16, #tpu.memory_space<vmem>>, vector<1x32x8xbf16>
    %6 = vector.shape_cast %5 : vector<1x32x8xbf16> to vector<32x8xbf16>
    %c0_8 = arith.constant 0 : index
    %c0_9 = arith.constant 0 : index
    %c0_10 = arith.constant 0 : index
    %c1_11 = arith.constant 1 : index
    %7 = vector.load %arg2[%c0_8, %c0_9, %c0_10, %c1_11] : memref<1x1x8x166xbf16, #tpu.memory_space<vmem>>, vector<1x1x8x128xbf16>
    %8 = vector.shape_cast %7 : vector<1x1x8x128xbf16> to vector<8x128xbf16>
    %cst_12 = arith.constant dense<0.000000e+00> : vector<32x128xf32>
    %9 = tpu.matmul %6, %8, %cst_12 {dimension_numbers = #tpu.dot_dimension_numbers<[1], [0], [0], [1], [0, 0, 1, 1], [], []>} : vector<32x8xbf16>, vector<8x128xbf16>, vector<32x128xf32> -> vector<32x128xf32>
    %10 = arith.addf %4, %9 : vector<32x128xf32>
    %c2 = arith.constant 2 : index
    %c0_13 = arith.constant 0 : index
    %c0_14 = arith.constant 0 : index
    %11 = vector.load %arg3[%c2, %c0_13, %c0_14] : memref<9x32x8xbf16, #tpu.memory_space<vmem>>, vector<1x32x8xbf16>
    %12 = vector.shape_cast %11 : vector<1x32x8xbf16> to vector<32x8xbf16>
    %c0_15 = arith.constant 0 : index
    %c0_16 = arith.constant 0 : index
    %c0_17 = arith.constant 0 : index
    %c2_18 = arith.constant 2 : index
    %13 = vector.load %arg2[%c0_15, %c0_16, %c0_17, %c2_18] : memref<1x1x8x166xbf16, #tpu.memory_space<vmem>>, vector<1x1x8x128xbf16>
    %14 = vector.shape_cast %13 : vector<1x1x8x128xbf16> to vector<8x128xbf16>
    %cst_19 = arith.constant dense<0.000000e+00> : vector<32x128xf32>
    %15 = tpu.matmul %12, %14, %cst_19 {dimension_numbers = #tpu.dot_dimension_numbers<[1], [0], [0], [1], [0, 0, 1, 1], [], []>} : vector<32x8xbf16>, vector<8x128xbf16>, vector<32x128xf32> -> vector<32x128xf32>
    %16 = arith.addf %10, %15 : vector<32x128xf32>
    %c3 = arith.constant 3 : index
    %c0_20 = arith.constant 0 : index
    %c0_21 = arith.constant 0 : index
    %17 = vector.load %arg3[%c3, %c0_20, %c0_21] : memref<9x32x8xbf16, #tpu.memory_space<vmem>>, vector<1x32x8xbf16>
    %18 = vector.shape_cast %17 : vector<1x32x8xbf16> to vector<32x8xbf16>
    %c0_22 = arith.constant 0 : index
    %c0_23 = arith.constant 0 : index
    %c0_24 = arith.constant 0 : index
    %c18 = arith.constant 18 : index
    %19 = vector.load %arg2[%c0_22, %c0_23, %c0_24, %c18] : memref<1x1x8x166xbf16, #tpu.memory_space<vmem>>, vector<1x1x8x128xbf16>
    %20 = vector.shape_cast %19 : vector<1x1x8x128xbf16> to vector<8x128xbf16>
    %cst_25 = arith.constant dense<0.000000e+00> : vector<32x128xf32>
    %21 = tpu.matmul %18, %20, %cst_25 {dimension_numbers = #tpu.dot_dimension_numbers<[1], [0], [0], [1], [0, 0, 1, 1], [], []>} : vector<32x8xbf16>, vector<8x128xbf16>, vector<32x128xf32> -> vector<32x128xf32>
    %22 = arith.addf %16, %21 : vector<32x128xf32>
    %c4 = arith.constant 4 : index
    %c0_26 = arith.constant 0 : index
    %c0_27 = arith.constant 0 : index
    %23 = vector.load %arg3[%c4, %c0_26, %c0_27] : memref<9x32x8xbf16, #tpu.memory_space<vmem>>, vector<1x32x8xbf16>
    %24 = vector.shape_cast %23 : vector<1x32x8xbf16> to vector<32x8xbf16>
    %c0_28 = arith.constant 0 : index
    %c0_29 = arith.constant 0 : index
    %c0_30 = arith.constant 0 : index
    %c19 = arith.constant 19 : index
    %25 = vector.load %arg2[%c0_28, %c0_29, %c0_30, %c19] : memref<1x1x8x166xbf16, #tpu.memory_space<vmem>>, vector<1x1x8x128xbf16>
    %26 = vector.shape_cast %25 : vector<1x1x8x128xbf16> to vector<8x128xbf16>
    %cst_31 = arith.constant dense<0.000000e+00> : vector<32x128xf32>
    %27 = tpu.matmul %24, %26, %cst_31 {dimension_numbers = #tpu.dot_dimension_numbers<[1], [0], [0], [1], [0, 0, 1, 1], [], []>} : vector<32x8xbf16>, vector<8x128xbf16>, vector<32x128xf32> -> vector<32x128xf32>
    %28 = arith.addf %22, %27 : vector<32x128xf32>
    %c5 = arith.constant 5 : index
    %c0_32 = arith.constant 0 : index
    %c0_33 = arith.constant 0 : index
    %29 = vector.load %arg3[%c5, %c0_32, %c0_33] : memref<9x32x8xbf16, #tpu.memory_space<vmem>>, vector<1x32x8xbf16>
    %30 = vector.shape_cast %29 : vector<1x32x8xbf16> to vector<32x8xbf16>
    %c0_34 = arith.constant 0 : index
    %c0_35 = arith.constant 0 : index
    %c0_36 = arith.constant 0 : index
    %c20 = arith.constant 20 : index
    %31 = vector.load %arg2[%c0_34, %c0_35, %c0_36, %c20] : memref<1x1x8x166xbf16, #tpu.memory_space<vmem>>, vector<1x1x8x128xbf16>
    %32 = vector.shape_cast %31 : vector<1x1x8x128xbf16> to vector<8x128xbf16>
    %cst_37 = arith.constant dense<0.000000e+00> : vector<32x128xf32>
    %33 = tpu.matmul %30, %32, %cst_37 {dimension_numbers = #tpu.dot_dimension_numbers<[1], [0], [0], [1], [0, 0, 1, 1], [], []>} : vector<32x8xbf16>, vector<8x128xbf16>, vector<32x128xf32> -> vector<32x128xf32>
    %34 = arith.addf %28, %33 : vector<32x128xf32>
    %c6 = arith.constant 6 : index
    %c0_38 = arith.constant 0 : index
    %c0_39 = arith.constant 0 : index
    %35 = vector.load %arg3[%c6, %c0_38, %c0_39] : memref<9x32x8xbf16, #tpu.memory_space<vmem>>, vector<1x32x8xbf16>
    %36 = vector.shape_cast %35 : vector<1x32x8xbf16> to vector<32x8xbf16>
    %c0_40 = arith.constant 0 : index
    %c0_41 = arith.constant 0 : index
    %c0_42 = arith.constant 0 : index
    %c36 = arith.constant 36 : index
    %37 = vector.load %arg2[%c0_40, %c0_41, %c0_42, %c36] : memref<1x1x8x166xbf16, #tpu.memory_space<vmem>>, vector<1x1x8x128xbf16>
    %38 = vector.shape_cast %37 : vector<1x1x8x128xbf16> to vector<8x128xbf16>
    %cst_43 = arith.constant dense<0.000000e+00> : vector<32x128xf32>
    %39 = tpu.matmul %36, %38, %cst_43 {dimension_numbers = #tpu.dot_dimension_numbers<[1], [0], [0], [1], [0, 0, 1, 1], [], []>} : vector<32x8xbf16>, vector<8x128xbf16>, vector<32x128xf32> -> vector<32x128xf32>
    %40 = arith.addf %34, %39 : vector<32x128xf32>
    %c7 = arith.constant 7 : index
    %c0_44 = arith.constant 0 : index
    %c0_45 = arith.constant 0 : index
    %41 = vector.load %arg3[%c7, %c0_44, %c0_45] : memref<9x32x8xbf16, #tpu.memory_space<vmem>>, vector<1x32x8xbf16>
    %42 = vector.shape_cast %41 : vector<1x32x8xbf16> to vector<32x8xbf16>
    %c0_46 = arith.constant 0 : index
    %c0_47 = arith.constant 0 : index
    %c0_48 = arith.constant 0 : index
    %c37 = arith.constant 37 : index
    %43 = vector.load %arg2[%c0_46, %c0_47, %c0_48, %c37] : memref<1x1x8x166xbf16, #tpu.memory_space<vmem>>, vector<1x1x8x128xbf16>
    %44 = vector.shape_cast %43 : vector<1x1x8x128xbf16> to vector<8x128xbf16>
    %cst_49 = arith.constant dense<0.000000e+00> : vector<32x128xf32>
    %45 = tpu.matmul %42, %44, %cst_49 {dimension_numbers = #tpu.dot_dimension_numbers<[1], [0], [0], [1], [0, 0, 1, 1], [], []>} : vector<32x8xbf16>, vector<8x128xbf16>, vector<32x128xf32> -> vector<32x128xf32>
    %46 = arith.addf %40, %45 : vector<32x128xf32>
    %c8 = arith.constant 8 : index
    %c0_50 = arith.constant 0 : index
    %c0_51 = arith.constant 0 : index
    %47 = vector.load %arg3[%c8, %c0_50, %c0_51] : memref<9x32x8xbf16, #tpu.memory_space<vmem>>, vector<1x32x8xbf16>
    %48 = vector.shape_cast %47 : vector<1x32x8xbf16> to vector<32x8xbf16>
    %c0_52 = arith.constant 0 : index
    %c0_53 = arith.constant 0 : index
    %c0_54 = arith.constant 0 : index
    %c38 = arith.constant 38 : index
    %49 = vector.load %arg2[%c0_52, %c0_53, %c0_54, %c38] : memref<1x1x8x166xbf16, #tpu.memory_space<vmem>>, vector<1x1x8x128xbf16>
    %50 = vector.shape_cast %49 : vector<1x1x8x128xbf16> to vector<8x128xbf16>
    %cst_55 = arith.constant dense<0.000000e+00> : vector<32x128xf32>
    %51 = tpu.matmul %48, %50, %cst_55 {dimension_numbers = #tpu.dot_dimension_numbers<[1], [0], [0], [1], [0, 0, 1, 1], [], []>} : vector<32x8xbf16>, vector<8x128xbf16>, vector<32x128xf32> -> vector<32x128xf32>
    %52 = arith.addf %46, %51 : vector<32x128xf32>
    %c0_56 = arith.constant 0 : index
    %c0_57 = arith.constant 0 : index
    %53 = vector.load %arg4[%c0_56, %c0_57] : memref<32x1xf32, #tpu.memory_space<vmem>>, vector<32x1xf32>
    %54 = vector.broadcast %53 : vector<32x1xf32> to vector<32x128xf32>
    %55 = arith.addf %52, %54 : vector<32x128xf32>
    %cst_58 = arith.constant 0.000000e+00 : f32
    %56 = vector.broadcast %cst_58 : f32 to vector<32x128xf32>
    %57 = arith.maximumf %55, %56 : vector<32x128xf32>
    %c0_59 = arith.constant 0 : index
    %c0_60 = arith.constant 0 : index
    %c0_61 = arith.constant 0 : index
    %58 = vector.load %arg5[%c0_59, %c0_60, %c0_61] : memref<1x32x128xf32, #tpu.memory_space<vmem>>, vector<1x32x128xf32>
    %59 = vector.shape_cast %58 : vector<1x32x128xf32> to vector<32x128xf32>
    %60 = vector.shape_cast %57 : vector<32x128xf32> to vector<1x32x128xf32>
    tpu.vector_store %arg5[%c0_59, %c0_60, %c0_61], %60 {strides = array<i32>} : memref<1x32x128xf32, #tpu.memory_space<vmem>>, vector<1x32x128xf32>,
    return
  }
  func.func @transform_0(%arg0: i32, %arg1: i32) -> (i32, i32, i32, i32) {
    %c0_i32 = arith.constant 0 : i32
    %c0_i32_0 = arith.constant 0 : i32
    %c0_i32_1 = arith.constant 0 : i32
    return %arg0, %arg1, %c0_i32, %c0_i32_0 : i32, i32, i32, i32
  }
  func.func @transform_1(%arg0: i32, %arg1: i32) -> (i32, i32, i32) {
    %c0_i32 = arith.constant 0 : i32
    %c0_i32_0 = arith.constant 0 : i32
    %c0_i32_1 = arith.constant 0 : i32
    %c0_i32_2 = arith.constant 0 : i32
    return %c0_i32, %c0_i32_0, %c0_i32_1 : i32, i32, i32
  }
  func.func @transform_2(%arg0: i32, %arg1: i32) -> (i32, i32) {
    %c0_i32 = arith.constant 0 : i32
    %c0_i32_0 = arith.constant 0 : i32
    %c0_i32_1 = arith.constant 0 : i32
    return %c0_i32, %c0_i32_0 : i32, i32
  }
  func.func @transform_3(%arg0: i32, %arg1: i32) -> (i32, i32, i32) {
    %c0_i32 = arith.constant 0 : i32
    %c0_i32_0 = arith.constant 0 : i32
    return %arg0, %c0_i32, %arg1 : i32, i32, i32
  }
}

</mosaic_0001>

<bundles_post_ra>
// kernel: tpu_custom_call.1
= control target key start
LH: loop header
LB: loop body
LE: loop exit
PB: predicated region body
PF: predicated region fallthrough
CT: control target
= control target key end

     0   :  { %8 = vsyncpa [#allocation3], 0  ;;  %s1725_s0 = inlined_call_operand.vmem [shape: bf16[2,3,8,166], index: 0, kind: input, shape index: {}]   ;;  %s1726_s1 = inlined_call_operand.vmem [shape: bf16[9,32,8], index: 1, kind: input, shape index: {}]   ;;  %s1727_s2 = inlined_call_operand.vmem [shape: f32[32,1], index: 2, kind: input, shape index: {}]   ;;  %s1728_s3 = inlined_call_operand.hbm [shape: f32[2,32,384], index: 3, kind: output, shape index: {}]  }
   0x1   :  { %10 = vsyncpa [#allocation3 + $0x1], 0  ;;  %s1480_s12 = smov 0   ;;  %s1482_s13 = smov 0  }
   0x2   :  { %s1484_s14 = smov 0   ;;  %s1486_s15 = smov 0  }
   0x3   :  { %s1488_s16 = smov 0   ;;  %s1490_s17 = smov 0  }
   0x4   :  { %s1492_s18 = smov 0   ;;  %s1494_s19 = smov 0  }
   0x5 LB: > { %s1074_s20 = sadd.s32 4294967295, %s1445_s19   ;;  %s1075_s21 = sadd.s32 4294967294, %s1445_s19   ;;  %s1445_s19 = sphi %s1494_s19, %s16_s19   ;;  %s1441_s18 = sphi %s1492_s18, %s1737_s18   ;;  %s1437_s17 = sphi %s1490_s17, %s1736_s17   ;;  %s1433_s16 = sphi %s1488_s16, %s1735_s16   ;;  %s1429_s15 = sphi %s1486_s15, %s1734_s15   ;;  %s1425_s14 = sphi %s1484_s14, %s1733_s14   ;;  %s1421_s13 = sphi %s1482_s13, %s1732_s13   ;;  %s1417_s12 = sphi %s1480_s12, %s1731_s12  }
   0x6   : > { %s25_s22 = sadd.s32 1, %s1437_s17  ;;  %s28_s23 = sadd.s32 1, %s1441_s18 }
   0x7   : > { %p26_p0 = scmp.ge.s32.totalorder %s25_s22, 3  ;;  %p117_p1 = scmp.ne.s32.totalorder %s1425_s14, %s1421_s13 }
   0x8   : > { %p118_p2 = scmp.eq.s32.totalorder %s1074_s20, 5  ;;  %p123_p5 = scmp.ne.s32.totalorder %s1421_s13, %s1417_s12 }
   0x9   : > { %s1739_s22 = smov (%p26_p0, %s25_s22), 0  ;;  %s1741_s23 = smov (!%p26_p0, %s28_s23), %s1441_s18 }
   0xa   : > { %s103_s24 = ssub.s32 %s1437_s17, %s1739_s22  ;;  %p1531_p3 = por %p118_p2, %p117_p1 }
   0xb   : > { %p30_p4 = scmp.ge.s32.totalorder %s1741_s23, 2  ;;  %p124_p6 = scmp.eq.s32.totalorder %s1075_s21, 5 }
   0xc   : > { %p1078_p7 = scmp.ge.s32.totalorder %s1445_s19, 1  ;;  %p160_p9 = scmp.lt.s32.totalorder %s1445_s19, 7 }
   0xd   : > { %s1743_s23 = smov (%p30_p4, %s1741_s23), 0  ;;  %p1540_p8 = por %p124_p6, %p123_p5 }
   0xe   : > { %s102_s27 = ssub.s32 %s1441_s18, %s1743_s23  ;;  %s107_s28 = sadd.s32 1, %s1425_s14 }
   0xf   : > { %s104_s29 = sor.u32 %s103_s24, %s102_s27  ;;  %p161_p10 = pnand %p1078_p7, %p160_p9 }
  0x10   : > { %p105_p11 = scmp.eq.s32.totalorder %s104_s29, 0  ;;  %p188_p12 = scmp.lt.s32.totalorder (!%p161_p10), %s1433_s16, 1 }
  0x11   : > { %164 = sbr.rel (%p161_p10) target bundleno = 409 (0x199), region = 32  ;;  %p190_p13 = scmp.lt.s32.totalorder (!%p161_p10), %s1429_s15, 2 }
  0x12   : > { %s1549_s30 = scalar_select %p105_p11, %s1425_s14, %s107_s28  }
  0x13   : > { %s1449_s9 = smov (!%p161_p10), 110   ;;  %s1450_s10 = smov (!%p161_p10), 109  }
  0x14   : > { %s1451_s11 = smov (!%p161_p10), 108   ;;  %s1454_s24 = smov (!%p161_p10), 90  }
  0x16   : > { %s189_s4 = scalar_select %p188_p12, %s1433_s16, 1  ;;  %v1335_v0 = vld [vmem:[%s1726_s1 + $0x10] sm:$0xff]   ;;  %v1336_v1 = vld [vmem:[%s1726_s1] sm:$0xff]   ;;  %vm230_vm0 = vcmask 64512   ;;  %vm237_vm1 = vcmask 1043456   ;;  %v1338_v6 = vld [vmem:[%s1726_s1 + $0x8] sm:$0xff]  }
  0x17   : > { %s191_s5 = scalar_select %p190_p13, %s1429_s15, 2  ;;  %1185 = vmatprep.mubr.msk.bf16.mxu0 %vm230_vm0, %v1335_v0  ;;  %1191 = vmatprep.mubr.msk.bf16.mxu1 %vm230_vm0, %v1336_v1  ;;  %v1341_v8 = vld [vmem:[%s1726_s1 + $0x30] sm:$0xff]   ;;  %v1455_v9 = vmov 0   ;;  %v940_v10 = vld [vmem:[%s1727_s2 + $0x8] sm:$0xff]  ;;  %v939_v11 = vld [vmem:[%s1727_s2] sm:$0xff]  ;;  %vm377_vm2 = vcmask 1031168  }
  0x18   : > { %s1246_s6 = smul.u32 6, %s189_s4  ;;  %1332 = vset.pattern.permute.xlu1 %v1455_v9  ;;  %1331 = vset.pattern.permute.xlu0 %v1455_v9  ;;  %v941_v12 = vld [vmem:[%s1727_s2 + $0x10] sm:$0xff]  ;;  %v942_v13 = vld [vmem:[%s1727_s2 + $0x18] sm:$0xff]  ;;  %vm228_vm3 = vcmask 1039360   ;;  %vm460_vm4 = vcmask 900096   ;;  %v1339_v25 = vld [vmem:[%s1726_s1 + $0x20] sm:$0xff]  }
  0x19   : > { %s1080_s7 = sshll.u32 %s191_s5, 1  ;;  %s1447_s5 = smov 126   ;;  %v1337_v21 = vld [vmem:[%s1726_s1 + $0x18] sm:$0xff]   ;;  %vm543_vm5 = vcmask 891904   ;;  %v1345_v29 = vld [vmem:[%s1726_s1 + $0x50] sm:$0xff]   ;;  %v1340_v33 = vld [vmem:[%s1726_s1 + $0x28] sm:$0xff]  }
  0x1a   : > { %s194_s20 = sadd.s32 %s1246_s6, %s1080_s7  ;;  %s1448_s6 = smov 127   ;;  %v1342_v28 = vld [vmem:[%s1726_s1 + $0x38] sm:$0xff]   ;;  %vm626_vm6 = vcmask 883712   ;;  %v1343_v37 = vld [vmem:[%s1726_s1 + $0x40] sm:$0xff]   ;;  %vm709_vm7 = vcmask 752640   ;;  %v1349_v41 = vld [vmem:[%s1726_s1 + $0x70] sm:$0xff]  }
  0x1b   : > { %s1081_s21 = sshll.u32 %s194_s20, 2  ;;  %s1452_s20 = smov 92   ;;  %v1346_v40 = vld [vmem:[%s1726_s1 + $0x58] sm:$0xff]   ;;  %v1344_v45 = vld [vmem:[%s1726_s1 + $0x48] sm:$0xff]   ;;  %vm792_vm8 = vcmask 744448   ;;  %v1347_v49 = vld [vmem:[%s1726_s1 + $0x60] sm:$0xff]  }
  0x1c   : > { %s196_s28 = scalar_lea.vmem %s1725_s0, %s1081_s21  ;;  %s1453_s21 = smov 91   ;;  %vm875_vm9 = vcmask 736256   ;;  %v1350_v52 = vld [vmem:[%s1726_s1 + $0x78] sm:$0xff]   ;;  %v1348_v56 = vld [vmem:[%s1726_s1 + $0x68] sm:$0xff]   ;;  %v1351_v57 = vld [vmem:[%s1726_s1 + $0x80] sm:$0xff]  }
  0x1d   : > { %v208_v2 = vld [vmem:[%s196_s28] sm:$0xff]  ;;  %v1352_v59 = vld [vmem:[%s1726_s1 + $0x88] sm:$0xff]  }
  0x1e   : > { %v202_v3 = vld [vmem:[%s196_s28] sm:$0xf]  ;;  %v1088_v4 = vcombine.low %v208_v2, %v208_v2  ;;  %v1089_v7 = vcombine.high %v208_v2, %v208_v2 }
  0x1f   : > { %1238 = vmatprep.subr.msk.bf16.mxu1 %vm237_vm1, %v202_v3  ;;  %v307_v5 = vsel %vm237_vm1, %v202_v3, 0 }
  0x20   : > { %1190 = vmatpush3.bf16.msra.mxu1 %v307_v5  ;;  %373 = vrot.lane.b32.xlu1 %v1088_v4, %s1447_s5 }
  0x21   : > { %224 = vrot.lane.b32.xlu0 %v1088_v4, %s1448_s6 }
  0x23   : > { %1192 = vmatmul.mubr.msk.bf16.vlgmr.msra.gmra.mxu1 %vm230_vm0, %v1338_v6 }
  0x24   : > { %1203 = vmatprep.mubr.msk.bf16.mxu1 %vm230_vm0, %v1341_v8  ;;  %375 = vrot.lane.b32.xlu1 %v1089_v7, %s1447_s5  ;;  %s1456_s5 = smov [#allocation2]  }
  0x25   : > { %226 = vrot.lane.b32.xlu0 %v1089_v7, %s1448_s6  ;;  %s1357_s6 = sshll.u32 %s1456_s5, 4  ;;  %s1358_s6 = int_to_ptr.vmem [resolvable:$false] %s1357_s6 }
  0x26   : > { %s1359_s7 = scalar_lea.vmem %s1358_s6, 1024 }
  0x28   : > { %458 = vrot.lane.b32.xlu1 %v1089_v7, %s1449_s9 }
  0x29   : > { %456 = vrot.lane.b32.xlu0 %v1088_v4, %s1449_s9  ;;  %s185_s9 = sand.u32 1, %s1421_s13  }
  0x2a   : > { %s1674_s29 = scalar_lea.sflag [#allocation3], %s185_s9 }
  0x2c   : > { %541 = vrot.lane.b32.xlu1 %v1089_v7, %s1450_s10 }
  0x2d   : > { %539 = vrot.lane.b32.xlu0 %v1088_v4, %s1450_s10  ;;  %s1247_s10 = smul.u32 12, %s1433_s16 }
  0x30   : > { %624 = vrot.lane.b32.xlu1 %v1089_v7, %s1451_s11 }
  0x31   : > { %622 = vrot.lane.b32.xlu0 %v1088_v4, %s1451_s11  ;;  %s1079_s11 = sshll.u32 %s185_s9, 5 }
  0x34   : > { %707 = vrot.lane.b32.xlu1 %v1089_v7, %s1452_s20 }
  0x35   : > { %705 = vrot.lane.b32.xlu0 %v1088_v4, %s1452_s20  ;;  %s987_s20 = sadd.s32 %s1429_s15, %s1247_s10 }
  0x36   : > { %s1153_s16 = sshll.u32 %s987_s20, 7 }
  0x37   : > { %s1670_s28 = scalar_lea.hbm %s1728_s3, %s1153_s16 }
  0x38   : > { %790 = vrot.lane.b32.xlu1 %v1089_v7, %s1453_s21 }
  0x39   : > { %788 = vrot.lane.b32.xlu0 %v1088_v4, %s1453_s21  ;;  %s187_s21 = scalar_lea.vmem [#allocation2], %s1079_s11 }
  0x3c   : > { %873 = vrot.lane.b32.xlu1 %v1089_v7, %s1454_s24 }
  0x3d   : > { %871 = vrot.lane.b32.xlu0 %v1088_v4, %s1454_s24  ;;  %s990_s24 = sshll.u32 %s187_s21, 4  ;;  %s1665_s24 = int_to_ptr.vmem [resolvable:$true] %s990_s24 }
  0x3e   : > { %s1353_s4 = scalar_lea.vmem %s1665_s24, 512  ;;  %p1360_p4 = scmp.lt.s32.totalorder %s1665_s24, %s1358_s6 }
  0x3f   : > { %p1354_p0 = scmp.ne.s32.totalorder %s1665_s24, %s1353_s4  ;;  %p1361_p5 = scmp.lt.s32.totalorder %s1359_s7, %s1353_s4 }
  0x40   : > { %950 = vperm.xlu1 %1332, %v940_v10  }
  0x41   : > { %945 = vperm.xlu0 %1331, %v939_v11   ;;  %p1355_p1 = pnand %p1354_p0, %p1531_p3  ;;  %p1362_p6 = por %p1361_p5, %p1360_p4 }
  0x43   : > { %p1356_p2 = pneg %p1355_p1 }
  0x44   : > { %955 = vperm.xlu1 %1332, %v941_v12  }
  0x45   : > { %960 = vperm.xlu0 %1331, %v942_v13   ;;  %p1363_p7 = pnand %p1362_p6, %p1356_p2 }
  0x92   : > { %v374_v14 = vpop.permute.xlu1 %373 }
  0x93   : > { %v225_v15 = vpop.permute.xlu0 %224 }
  0x96   : > { %v376_v16 = vpop.permute.xlu1 %375 }
  0x97   : > { %v227_v17 = vpop.permute.xlu0 %226  ;;  %v378_v18 = vsel %vm377_vm2, %v374_v14, %v376_v16 }
  0x98   : > { %v229_v19 = vsel %vm228_vm3, %v225_v15, %v227_v17  ;;  %v386_v22 = vsel %vm237_vm1, %v378_v18, 0 }
  0x99   : > { %1237 = vmatprep.subr.msk.bf16.mxu0 %vm237_vm1, %v229_v19  ;;  %v239_v20 = vsel %vm237_vm1, %v229_v19, 0 }
  0x9a   : > { %1184 = vmatpush3.bf16.msra.mxu0 %v239_v20  ;;  %v459_v23 = vpop.permute.xlu1 %458 }
  0x9b   : > { %1239 = vmatprep.subr.msk.bf16.mxu0 %vm237_vm1, %v378_v18  ;;  %v457_v24 = vpop.permute.xlu0 %456 }
  0x9c   : > { %v461_v26 = vsel %vm460_vm4, %v457_v24, %v459_v23 }
  0x9d   : > { %1186 = vmatmul.mubr.msk.bf16.vlgmr.msra.gmra.mxu0 %vm230_vm0, %v1337_v21  ;;  %v469_v27 = vsel %vm237_vm1, %v461_v26, 0  ;;  %1240 = vmatprep.subr.msk.bf16.mxu1 %vm237_vm1, %v461_v26 }
  0x9e   : > { %1196 = vmatpush3.bf16.msra.mxu0 %v386_v22  ;;  %1202 = vmatpush3.bf16.msra.mxu1 %v469_v27  ;;  %v542_v30 = vpop.permute.xlu1 %541 }
  0x9f   : > { %v540_v31 = vpop.permute.xlu0 %539  ;;  %1197 = vmatprep.mubr.msk.bf16.mxu0 %vm230_vm0, %v1339_v25 }
  0xa0   : > { %v544_v32 = vsel %vm543_vm5, %v540_v31, %v542_v30 }
  0xa1   : > { %1241 = vmatprep.subr.msk.bf16.mxu0 %vm237_vm1, %v544_v32  ;;  %1204 = vmatmul.mubr.msk.bf16.vlgmr.msra.gmra.mxu1 %vm230_vm0, %v1342_v28  ;;  %v552_v34 = vsel %vm237_vm1, %v544_v32, 0 }
  0xa2   : > { %1215 = vmatprep.mubr.msk.bf16.mxu1 %vm230_vm0, %v1345_v29  ;;  %v625_v35 = vpop.permute.xlu1 %624 }
  0xa3   : > { %v623_v36 = vpop.permute.xlu0 %622 }
  0xa4   : > { %v627_v38 = vsel %vm626_vm6, %v623_v36, %v625_v35 }
  0xa5   : > { %1198 = vmatmul.mubr.msk.bf16.vlgmr.msra.gmra.mxu0 %vm230_vm0, %v1340_v33  ;;  %v635_v39 = vsel %vm237_vm1, %v627_v38, 0  ;;  %1242 = vmatprep.subr.msk.bf16.mxu1 %vm237_vm1, %v627_v38 }
  0xa6   : > { %1208 = vmatpush3.bf16.msra.mxu0 %v552_v34  ;;  %1214 = vmatpush3.bf16.msra.mxu1 %v635_v39  ;;  %v708_v42 = vpop.permute.xlu1 %707 }
  0xa7   : > { %v706_v43 = vpop.permute.xlu0 %705  ;;  %1209 = vmatprep.mubr.msk.bf16.mxu0 %vm230_vm0, %v1343_v37 }
  0xa8   : > { %v710_v44 = vsel %vm709_vm7, %v706_v43, %v708_v42 }
  0xa9   : > { %1243 = vmatprep.subr.msk.bf16.mxu0 %vm237_vm1, %v710_v44  ;;  %1216 = vmatmul.mubr.msk.bf16.vlgmr.msra.gmra.mxu1 %vm230_vm0, %v1346_v40  ;;  %v718_v46 = vsel %vm237_vm1, %v710_v44, 0 }
  0xaa   : > { %1227 = vmatprep.mubr.msk.bf16.mxu1 %vm230_vm0, %v1349_v41  ;;  %v791_v47 = vpop.permute.xlu1 %790 }
  0xab   : > { %v789_v48 = vpop.permute.xlu0 %788 }
  0xac   : > { %v793_v50 = vsel %vm792_vm8, %v789_v48, %v791_v47 }
  0xad   : > { %1210 = vmatmul.mubr.msk.bf16.vlgmr.msra.gmra.mxu0 %vm230_vm0, %v1344_v45  ;;  %v801_v51 = vsel %vm237_vm1, %v793_v50, 0  ;;  %1244 = vmatprep.subr.msk.bf16.mxu1 %vm237_vm1, %v793_v50 }
  0xae   : > { %1220 = vmatpush3.bf16.msra.mxu0 %v718_v46  ;;  %1226 = vmatpush3.bf16.msra.mxu1 %v801_v51  ;;  %v874_v53 = vpop.permute.xlu1 %873 }
  0xaf   : > { %v872_v54 = vpop.permute.xlu0 %871  ;;  %1221 = vmatprep.mubr.msk.bf16.mxu0 %vm230_vm0, %v1347_v49 }
  0xb0   : > { %v876_v55 = vsel %vm875_vm9, %v872_v54, %v874_v53 }
  0xb1   : > { %1245 = vmatprep.subr.msk.bf16.mxu0 %vm237_vm1, %v876_v55  ;;  %1228 = vmatmul.mubr.msk.bf16.vlgmr.msra.gmra.mxu1 %vm230_vm0, %v1350_v52  ;;  %v884_v58 = vsel %vm237_vm1, %v876_v55, 0 }
  0xb5   : > { %1222 = vmatmul.mubr.msk.bf16.vlgmr.msra.gmra.mxu0 %vm230_vm0, %v1348_v56 }
  0xb6   : > { %1232 = vmatpush3.bf16.msra.mxu0 %v884_v58  ;;  %1233 = vmatprep.mubr.msk.bf16.mxu0 %vm230_vm0, %v1351_v57 }
  0xbb   : > { %v951_v38 = vpop.permute.xlu1 %950 }
  0xbc   : > { %v946_v51 = vpop.permute.xlu0 %945 }
  0xbd   : > { %1234 = vmatmul.mubr.msk.bf16.vlgmr.msra.gmra.mxu0 %vm230_vm0, %v1352_v59 }
  0xbf   : > { %v956_v52 = vpop.permute.xlu1 %955 }
  0xe3   : > { %v1193_v60 = vpop.f32.mrf.mxu1 }
  0xe5   : > { %v343_v61 = vpop.f32.mrf.mxu1 }
  0xe7   : > { %v1194_v62 = vpop.f32.mrf.mxu1 }
  0xe9   : > { %v346_v0 = vpop.f32.mrf.mxu1 }
 0x15d   : > { %v1187_v63 = vpop.f32.mrf.mxu0 }
 0x15e   : > { %v352_v12 = vadd.f32 %v1193_v60, %v1187_v63 }
 0x15f   : > { %v275_v1 = vpop.f32.mrf.mxu0 }
 0x160   : > { %v344_v15 = vadd.f32 %v343_v61, %v275_v1 }
 0x161   : > { %v1188_v2 = vpop.f32.mrf.mxu0  ;;  %v1205_v3 = vpop.f32.mrf.mxu1 }
 0x162   : > { %v355_v19 = vadd.f32 %v1194_v62, %v1188_v2 }
 0x163   : > { %v278_v4 = vpop.f32.mrf.mxu0  ;;  %v505_v5 = vpop.f32.mrf.mxu1 }
 0x164   : > { %v347_v22 = vadd.f32 %v346_v0, %v278_v4  ;;  %v961_v4 = vpop.permute.xlu0 %960 }
 0x165   : > { %v1199_v6 = vpop.f32.mrf.mxu0  ;;  %v1206_v7 = vpop.f32.mrf.mxu1 }
 0x166   : > { %v439_v16 = vadd.f32 %v1199_v6, %v352_v12 }
 0x167   : > { %v422_v8 = vpop.f32.mrf.mxu0  ;;  %v508_v9 = vpop.f32.mrf.mxu1 }
 0x168   : > { %v437_v20 = vadd.f32 %v422_v8, %v344_v15  ;;  %v522_v23 = vadd.f32 %v1205_v3, %v439_v16 }
 0x169   : > { %v1200_v10 = vpop.f32.mrf.mxu0  ;;  %v1217_v11 = vpop.f32.mrf.mxu1 }
 0x16a   : > { %v440_v24 = vadd.f32 %v1200_v10, %v355_v19  ;;  %v520_v27 = vadd.f32 %v505_v5, %v437_v20 }
 0x16b   : > { %v425_v13 = vpop.f32.mrf.mxu0  ;;  %v671_v14 = vpop.f32.mrf.mxu1 }
 0x16c   : > { %v438_v28 = vadd.f32 %v425_v13, %v347_v22  ;;  %v523_v31 = vadd.f32 %v1206_v7, %v440_v24 }
 0x16d   : > { %v1211_v17 = vpop.f32.mrf.mxu0  ;;  %v1218_v18 = vpop.f32.mrf.mxu1 }
 0x16e   : > { %v605_v29 = vadd.f32 %v1211_v17, %v522_v23  ;;  %v521_v35 = vadd.f32 %v508_v9, %v438_v28 }
 0x16f   : > { %v588_v21 = vpop.f32.mrf.mxu0  ;;  %v674_v26 = vpop.f32.mrf.mxu1 }
 0x170   : > { %v603_v32 = vadd.f32 %v588_v21, %v520_v27  ;;  %v688_v36 = vadd.f32 %v1217_v11, %v605_v29 }
 0x171   : > { %v1212_v25 = vpop.f32.mrf.mxu0  ;;  %v1229_v34 = vpop.f32.mrf.mxu1 }
 0x172   : > { %v606_v37 = vadd.f32 %v1212_v25, %v523_v31  ;;  %v686_v40 = vadd.f32 %v671_v14, %v603_v32 }
 0x173   : > { %v591_v30 = vpop.f32.mrf.mxu0  ;;  %v837_v43 = vpop.f32.mrf.mxu1 }
 0x174   : > { %v604_v41 = vadd.f32 %v591_v30, %v521_v35  ;;  %v689_v45 = vadd.f32 %v1218_v18, %v606_v37 }
 0x175   : > { %v1223_v33 = vpop.f32.mrf.mxu0  ;;  %v1230_v53 = vpop.f32.mrf.mxu1 }
 0x176   : > { %v771_v42 = vadd.f32 %v1223_v33, %v688_v36  ;;  %v687_v48 = vadd.f32 %v674_v26, %v604_v41 }
 0x177   : > { %v754_v39 = vpop.f32.mrf.mxu0  ;;  %v840_v62 = vpop.f32.mrf.mxu1 }
 0x178   : > { %v769_v46 = vadd.f32 %v754_v39, %v686_v40  ;;  %v854_v49 = vadd.f32 %v1229_v34, %v771_v42 }
 0x179   : > { %v1224_v44 = vpop.f32.mrf.mxu0 }
 0x17a   : > { %v772_v50 = vadd.f32 %v1224_v44, %v689_v45  ;;  %v852_v55 = vadd.f32 %v837_v43, %v769_v46 }
 0x17b   : > { %v757_v47 = vpop.f32.mrf.mxu0 }
 0x17c   : > { %v770_v56 = vadd.f32 %v757_v47, %v687_v48  ;;  %v855_v59 = vadd.f32 %v1230_v53, %v772_v50 }
 0x17d   : > { %v1235_v54 = vpop.f32.mrf.mxu0 }
 0x17e   : > { %v937_v57 = vadd.f32 %v1235_v54, %v854_v49  ;;  %v853_v0 = vadd.f32 %v840_v62, %v770_v56 }
 0x17f   : > { %v920_v58 = vpop.f32.mrf.mxu0 }
 0x180   : > { %v965_v60 = vadd.f32 %v956_v52, %v937_v57  ;;  %v935_v61 = vadd.f32 %v920_v58, %v852_v55 }
 0x181   : > { %v1236_v63 = vpop.f32.mrf.mxu0 }
 0x182   : > { %v969_v1 = vmax.f32 %v965_v60, 0.0  ;;  %v963_v2 = vadd.f32 %v946_v51, %v935_v61  ;;  %v938_v3 = vadd.f32 %v1236_v63, %v855_v59 }
 0x183   : > { %v923_v5 = vpop.f32.mrf.mxu0 }
 0x184   : > { %973 = vst [vmem:[%s187_s21 + $0x10] sm:$0xff] %v969_v1  ;;  %v967_v6 = vmax.f32 %v963_v2, 0.0  ;;  %v966_v7 = vadd.f32 %v961_v4, %v938_v3  ;;  %v936_v8 = vadd.f32 %v923_v5, %v853_v0 }
 0x186   : > { %971 = vst [vmem:[%s187_s21] sm:$0xff] %v967_v6  ;;  %v970_v9 = vmax.f32 %v966_v7, 0.0  ;;  %v964_v10 = vadd.f32 %v951_v38, %v936_v8 }
 0x188   : > { %974 = vst [vmem:[%s187_s21 + $0x18] sm:$0xff] %v970_v9  ;;  %v968_v11 = vmax.f32 %v964_v10, 0.0 }
 0x18a   : > { %972 = vst [vmem:[%s187_s21 + $0x8] sm:$0xff] %v968_v11 }
 0x18b   : > { %1366 = shalt.err (!%p1363_p7)
}
 0x18c   : > { %s1367_s8 = scalar_lea.hbm %s1670_s28, 512  ;;  %s1371_s11 = scalar_lea.hbm %s1728_s3, 3072 }
 0x18d   : > { %p1368_p9 = scmp.ne.s32.totalorder %s1670_s28, %s1367_s8  ;;  %p1372_p12 = scmp.lt.s32.totalorder %s1670_s28, %s1728_s3 }
 0x18e   : > { %p1373_p13 = scmp.lt.s32.totalorder %s1371_s11, %s1367_s8 }
 0x18f   : > { %p1369_p10 = pnand %p1368_p9, %p1531_p3 }
 0x190   : > { %p1374_p0 = por %p1373_p13, %p1372_p12 }
 0x191   : > { %p1370_p11 = pneg %p1369_p10 }
 0x193   : > { %p1375_p1 = pnand %p1374_p0, %p1370_p11 }
 0x195   : > { %1378 = shalt.err (!%p1375_p1)
}
 0x196   : > { %s1457_s16 = smov 128   ;;  %s1458_s15 = smov 384  }
 0x197   : > { %s1459_s27 = smov 8  }
 0x198   : > { %1248 = dma.vmem_to_hbm [thread:$0]  (%p1531_p3), %s1665_s24, 512, %s1670_s28, %s1674_s29, %s1457_s16, %s1458_s15, %s1459_s27  }
 0x199 PF: > { %p1254_p2 = scmp.ge.s32.totalorder %s1445_s19, 2  ;;  %s1005_s4 = sand.u32 1, %s1417_s12  }
 0x19a   : > { %s1006_s5 = scalar_lea.sflag [#allocation3], %s1005_s4 }
 0x19b   : > { %p1251_p4 = pnand %p1254_p2, %p1540_p8 }
 0x19d   : > { %p1252_p5 = pneg %p1251_p4 }
 0x19f   : > { %1412 = dma.done.wait (%p1252_p5), %s1006_s5, 512  }
 0x1a0   : > { %1414 = vsyncadd (%p1252_p5), %s1006_s5, 4294966784  ;;  %s16_s19 = sadd.s32 1, %s1445_s19   ;;  %s1731_s12 = smov %s1421_s13 }
 0x1a1   : > { %p13_p6 = scmp.ge.s32.totalorder %s16_s19, 8   ;;  %s1732_s13 = smov %s1425_s14 }
 0x1a2   : > { %s1733_s14 = smov %s1549_s30  ;;  %s1734_s15 = smov %s1437_s17 }
 0x1a3   : > { %s1735_s16 = smov %s1441_s18  ;;  %s1736_s17 = smov %s1739_s22 }
 0x1a4   : > { %s1737_s18 = smov %s1743_s23  ;;  %15 = sbr.rel (!%p13_p6) target bundleno = 5 (0x5), region = 75 }
 0x1a9   :  { %1011 = vsyncpa [#allocation3], 1 }
 0x1aa   :  { %1013 = vsyncpa [#allocation3 + $0x1], 1 }

</bundles_post_ra>
